<compile_context>
chip_gen: v5e
topology: v5e:2x2
jax: 0.10.0
libtpu: 0.0.40
codegen_flags: <defaults>
</compile_context>

<pallas_src>
import numpy as np
import jax
import jax.numpy as jnp
from jax.experimental import pallas as pl
from jax.experimental.pallas import tpu as pltpu


# ---------------------------------------------------------------------------
# Glue: build the stacked low-rank (pool -> upsample) operator matrices.
# ---------------------------------------------------------------------------
def _adaptive_pool_matrix(in_size: int, bin_size: int) -> np.ndarray:
    """P[i, j] such that pooled = P @ x reproduces F.adaptive_avg_pool1d."""
    P = np.zeros((bin_size, in_size), dtype=np.float32)
    for i in range(bin_size):
        start = (i * in_size) // bin_size
        end = -((-(i + 1) * in_size) // bin_size)  # ceil((i+1)*in/bin)
        P[i, start:end] = 1.0 / float(end - start)
    return P


def _bilinear_upsample_matrix(out_size: int, in_size: int) -> np.ndarray:
    """U[i, j] such that up = U @ pooled reproduces bilinear, align_corners=True."""
    U = np.zeros((out_size, in_size), dtype=np.float32)
    if in_size == 1:
        U[:, 0] = 1.0
        return U
    scale = (in_size - 1) / (out_size - 1) if out_size > 1 else 0.0
    for i in range(out_size):
        src = i * scale
        lo = int(np.floor(src))
        hi = min(lo + 1, in_size - 1)
        frac = src - lo
        U[i, lo] += 1.0 - frac
        U[i, hi] += frac
    return U


def _build_lowrank_operators(H, W, pyramids, hw_pad, op_dtype):
    """Rt (hw_pad, r_pad), Lt (r_pad, hw_pad) with out = x + (x @ Rt) @ Lt."""
    pool_blocks, up_blocks = [], []
    for b in pyramids:
        Ph = _adaptive_pool_matrix(H, b)        # (b, H)
        Pw = _adaptive_pool_matrix(W, b)        # (b, W)
        Uh = _bilinear_upsample_matrix(H, b)    # (H, b)
        Uw = _bilinear_upsample_matrix(W, b)    # (W, b)
        pool_blocks.append(np.kron(Ph, Pw))     # (b*b, H*W)  exact 2-D adaptive pool
        up_blocks.append(np.kron(Uh, Uw))       # (H*W, b*b)  exact bilinear upsample
    R = np.concatenate(pool_blocks, axis=0)     # (r, HW)
    L = np.concatenate(up_blocks, axis=1)       # (HW, r)
    r = R.shape[0]                              # sum_b b^2 (= 50 for [1,2,3,6])
    r_pad = max(128, -(-r // 128) * 128)        # lane-align the tiny inner dim
    HW = H * W
    Rt = np.zeros((hw_pad, r_pad), dtype=np.float32)
    Rt[:HW, :r] = R.T
    Lt = np.zeros((r_pad, hw_pad), dtype=np.float32)
    Lt[:r, :HW] = L.T
    # Operators are cast to the matmul operand dtype (native MXU path for bf16 x).
    return jnp.asarray(Rt, dtype=op_dtype), jnp.asarray(Lt, dtype=op_dtype)


# ---------------------------------------------------------------------------
# Generation-aware tiling / VMEM budget selection.
# ---------------------------------------------------------------------------
def _select_tiling(NC, HW_pad, x_itemsize, r_pad, op_itemsize):
    try:
        vmem_cap = int(pltpu.get_tpu_info().vmem_capacity_bytes)
    except Exception:
        vmem_cap = 64 * 2**20                      # conservative (v7x per-core) fallback
    # Tile budget: half of physical VMEM, capped at 64 MiB -> 32 MiB on v7x,
    # 64 MiB on v5e/v6e.  vmem_limit_bytes adds headroom but stays below physical.
    budget = min(vmem_cap // 2, 64 * 2**20)
    vmem_limit = int(min(vmem_cap - 8 * 2**20, budget + 16 * 2**20))

    # Grid-constant operator matrices (Rt + Lt).  Single-buffer them only when the
    # default double-buffered residency would eat a big slice of the budget.
    op_2buf = 2 * 2 * HW_pad * r_pad * op_itemsize
    single_buffer_ops = op_2buf > budget // 4
    op_bytes = op_2buf // 2 if single_buffer_ops else op_2buf

    # Per channel-row VMEM: input block + output block (double-buffered) + f32 temps.
    per_row = 2 * HW_pad * x_itemsize + 2 * HW_pad * x_itemsize + 2 * HW_pad * 4
    tc_max = max(1, (budget - op_bytes) // per_row)

    # MXU-friendly granule for the M dimension.
    if NC < 8:
        granule = max(1, NC)                       # full-dim block (allowed by Pallas)
    elif NC >= 256:
        granule = 256
    elif NC >= 128:
        granule = 128
    else:
        granule = 8

    tc_cap = max(granule, (NC // granule) * granule)
    tc = min(tc_max, 1024, tc_cap)
    tc = max(granule, (tc // granule) * granule)
    # Keep >= 2 grid steps on big problems so both v7x TensorCores get work.
    if NC >= 256 and tc >= NC:
        tc = max(128, ((NC // 2) // 128) * 128)
    return int(tc), int(vmem_limit), bool(single_buffer_ops)


# ---------------------------------------------------------------------------
# Pallas kernel: out = x + (x @ Rt) @ Lt on one (TC, HW_pad) channel block.
# ---------------------------------------------------------------------------
def ppm_kernel(x_ref, rt_ref, lt_ref, o_ref):
    x = x_ref[...]                                                           # native dtype
    pooled = jnp.dot(x, rt_ref[...], preferred_element_type=jnp.float32)    # (TC, r_pad) f32
    up = jnp.dot(pooled.astype(lt_ref.dtype), lt_ref[...],
                 preferred_element_type=jnp.float32)                        # (TC, HW_pad) f32
    o_ref[...] = (x.astype(jnp.float32) + up).astype(o_ref.dtype)           # f32 residual add


def pyramid_pooling_module(x: jax.Array, pyramids=(1, 2, 3, 6),
                           channel_block=None) -> jax.Array:
    """x: (N, C, H, W) -> (N, C, H, W), matching PyramidPoolingModule.forward."""
    N, C, H, W = x.shape
    NC, HW = N * C, H * W
    HW_pad = max(128, -(-HW // 128) * 128)          # lane-dense stores; no-op if aligned

    op_dtype = x.dtype                              # MXU operands in x's native dtype
    Rt, Lt = _build_lowrank_operators(H, W, pyramids, HW_pad, op_dtype)
    r_pad = Rt.shape[1]

    x_itemsize = jnp.dtype(x.dtype).itemsize
    op_itemsize = jnp.dtype(op_dtype).itemsize
    TC, vmem_limit, single_buffer_ops = _select_tiling(
        NC, HW_pad, x_itemsize, r_pad, op_itemsize)
    if channel_block is not None:
        TC = int(channel_block)
        if NC < 8:
            TC = NC
        else:
            TC = max(8, min((TC // 8) * 8, max(8, (NC // 8) * 8)))

    x2 = x.reshape(NC, HW)                          # channels on rows, pixels on lanes
    if HW_pad != HW:
        x2 = jnp.pad(x2, ((0, 0), (0, HW_pad - HW)))

    # No row padding: Pallas clips the ragged last block (rows are independent).
    G = pl.cdiv(NC, TC)

    x_spec = pl.BlockSpec((TC, HW_pad), lambda i: (i, 0))
    o_spec = pl.BlockSpec((TC, HW_pad), lambda i: (i, 0))
    if single_buffer_ops:
        # Grid-constant operators: single-buffer to halve their VMEM residency.
        rt_spec = pl.BlockSpec((HW_pad, r_pad), lambda i: (0, 0),
                               pipeline_mode=pl.Buffered(1))
        lt_spec = pl.BlockSpec((r_pad, HW_pad), lambda i: (0, 0),
                               pipeline_mode=pl.Buffered(1))
    else:
        rt_spec = pl.BlockSpec((HW_pad, r_pad), lambda i: (0, 0))
        lt_spec = pl.BlockSpec((r_pad, HW_pad), lambda i: (0, 0))

    cost = pl.CostEstimate(
        flops=4 * NC * HW_pad * r_pad,                       # two matmuls
        transcendentals=0,
        bytes_accessed=2 * NC * HW_pad * x_itemsize          # read x + write out
        + 2 * HW_pad * r_pad * op_itemsize,                  # operator matrices
    )

    # TODO(synk): input_output_aliases to reuse the x2 HBM buffer was considered but
    # skipped (x may be live in the caller); it only saves footprint, not bandwidth.
    out2 = pl.pallas_call(
        ppm_kernel,
        out_shape=jax.ShapeDtypeStruct((NC, HW_pad), x.dtype),
        grid_spec=pltpu.PrefetchScalarGridSpec(
            num_scalar_prefetch=0,
            grid=(G,),
            in_specs=[x_spec, rt_spec, lt_spec],
            out_specs=o_spec,
        ),
        compiler_params=pltpu.CompilerParams(
            dimension_semantics=("parallel",),
            vmem_limit_bytes=vmem_limit,
        ),
        cost_estimate=cost,
    )(x2, Rt, Lt)

    if HW_pad != HW:
        out2 = out2[:, :HW]
    return out2.reshape(N, C, H, W)


# ---------------------------------------------------------------------------
# Pure-numpy reference with the exact PyTorch semantics (align_corners=True,
# matching the original module's F.interpolate call).
# ---------------------------------------------------------------------------
def _reference_numpy(x: np.ndarray, pyramids=(1, 2, 3, 6)) -> np.ndarray:
    N, C, H, W = x.shape
    feat = x.astype(np.float32).copy()
    for b in pyramids:
        pooled = np.zeros((N, C, b, b), dtype=np.float32)
        for i in range(b):
            h0, h1 = (i * H) // b, -((-(i + 1) * H) // b)
            for j in range(b):
                w0, w1 = (j * W) // b, -((-(j + 1) * W) // b)
                pooled[:, :, i, j] = x[:, :, h0:h1, w0:w1].mean(axis=(2, 3))
        up = np.zeros((N, C, H, W), dtype=np.float32)
        sy = (b - 1) / (H - 1) if H > 1 else 0.0
        sx = (b - 1) / (W - 1) if W > 1 else 0.0
        for yy in range(H):
            ysrc = yy * sy
            y0 = int(np.floor(ysrc))
            y1 = min(y0 + 1, b - 1)
            fy = ysrc - y0
            for xx in range(W):
                xsrc = xx * sx
                x0 = int(np.floor(xsrc))
                x1 = min(x0 + 1, b - 1)
                fx = xsrc - x0
                up[:, :, yy, xx] = (
                    pooled[:, :, y0, x0] * (1 - fy) * (1 - fx)
                    + pooled[:, :, y0, x1] * (1 - fy) * fx
                    + pooled[:, :, y1, x0] * fy * (1 - fx)
                    + pooled[:, :, y1, x1] * fy * fx
                )
        feat = feat + up
    return feat


if __name__ == "__main__":
    key = jax.random.PRNGKey(0)
    N, C, H, W = 2, 4, 16, 16
    x = jax.random.normal(key, (N, C, H, W), dtype=jnp.float32)

    out = pyramid_pooling_module(x, pyramids=(1, 2, 3, 6))
    out = jax.block_until_ready(out)

    ref = _reference_numpy(np.asarray(x), pyramids=(1, 2, 3, 6))
    np.testing.assert_allclose(np.asarray(out), ref, rtol=1e-4, atol=1e-4)

    print("KERNEL_OK")
</pallas_src>

<mosaic_0001>
module attributes {stable_mosaic.version = 11 : i64} {
  func.func @ppm_kernel(%arg0: i32, %arg1: memref<8x256xf32, #tpu.memory_space<vmem>>, %arg2: memref<256x128xf32, #tpu.memory_space<vmem>>, %arg3: memref<128x256xf32, #tpu.memory_space<vmem>>, %arg4: memref<8x256xf32, #tpu.memory_space<vmem>>) attributes {dimension_semantics = [#tpu.dimension_semantics<parallel>], iteration_bounds = array<i64: 1>, scalar_prefetch = 0 : i64, scratch_operands = 0 : i64, tpu.core_type = #tpu.core_type<tc>, window_params = [{transform_indices = @transform_0, window_bounds = array<i64: 8, 256>}, {pipeline_mode = #tpu.pipeline_mode<synchronous>, transform_indices = @transform_1, window_bounds = array<i64: 256, 128>}, {pipeline_mode = #tpu.pipeline_mode<synchronous>, transform_indices = @transform_2, window_bounds = array<i64: 128, 256>}, {transform_indices = @transform_3, window_bounds = array<i64: 8, 256>}]} {
    %c0 = arith.constant 0 : index
    %c0_0 = arith.constant 0 : index
    %0 = vector.load %arg1[%c0, %c0_0] : memref<8x256xf32, #tpu.memory_space<vmem>>, vector<8x256xf32>
    %c0_1 = arith.constant 0 : index
    %c0_2 = arith.constant 0 : index
    %1 = vector.load %arg2[%c0_1, %c0_2] : memref<256x128xf32, #tpu.memory_space<vmem>>, vector<256x128xf32>
    %cst = arith.constant dense<0.000000e+00> : vector<8x128xf32>
    %2 = tpu.matmul %0, %1, %cst {dimension_numbers = #tpu.dot_dimension_numbers<[1], [0], [0], [1], [0, 0, 1, 1], [], []>} : vector<8x256xf32>, vector<256x128xf32>, vector<8x128xf32> -> vector<8x128xf32>
    %c0_3 = arith.constant 0 : index
    %c0_4 = arith.constant 0 : index
    %3 = vector.load %arg3[%c0_3, %c0_4] : memref<128x256xf32, #tpu.memory_space<vmem>>, vector<128x256xf32>
    %cst_5 = arith.constant dense<0.000000e+00> : vector<8x256xf32>
    %4 = tpu.matmul %2, %3, %cst_5 {dimension_numbers = #tpu.dot_dimension_numbers<[1], [0], [0], [1], [0, 0, 1, 1], [], []>} : vector<8x128xf32>, vector<128x256xf32>, vector<8x256xf32> -> vector<8x256xf32>
    %5 = arith.addf %0, %4 : vector<8x256xf32>
    %c0_6 = arith.constant 0 : index
    %c0_7 = arith.constant 0 : index
    %6 = vector.load %arg4[%c0_6, %c0_7] : memref<8x256xf32, #tpu.memory_space<vmem>>, vector<8x256xf32>
    tpu.vector_store %arg4[%c0_6, %c0_7], %5 {strides = array<i32>} : memref<8x256xf32, #tpu.memory_space<vmem>>, vector<8x256xf32>,
    return
  }
  func.func @transform_0(%arg0: i32) -> (i32, i32) {
    %c0_i32 = arith.constant 0 : i32
    %c0_i32_0 = arith.constant 0 : i32
    return %arg0, %c0_i32 : i32, i32
  }
  func.func @transform_1(%arg0: i32) -> (i32, i32) {
    %c0_i32 = arith.constant 0 : i32
    %c0_i32_0 = arith.constant 0 : i32
    %c0_i32_1 = arith.constant 0 : i32
    return %c0_i32, %c0_i32_0 : i32, i32
  }
  func.func @transform_2(%arg0: i32) -> (i32, i32) {
    %c0_i32 = arith.constant 0 : i32
    %c0_i32_0 = arith.constant 0 : i32
    %c0_i32_1 = arith.constant 0 : i32
    return %c0_i32, %c0_i32_0 : i32, i32
  }
  func.func @transform_3(%arg0: i32) -> (i32, i32) {
    %c0_i32 = arith.constant 0 : i32
    %c0_i32_0 = arith.constant 0 : i32
    return %arg0, %c0_i32 : i32, i32
  }
}

</mosaic_0001>

<bundles_post_ra>
// kernel: tpu_custom_call.1
= control target key start
LH: loop header
LB: loop body
LE: loop exit
PB: predicated region body
PF: predicated region fallthrough
CT: control target
= control target key end

     0   :  { %8 = vsyncpa [#allocation3], 0  ;;  %s378_s0 = inlined_call_operand.hbm [shape: f32[8,256], index: 0, kind: input, shape index: {}]   ;;  %s379_s1 = inlined_call_operand.hbm [shape: f32[256,128], index: 1, kind: input, shape index: {}]   ;;  %s380_s2 = inlined_call_operand.hbm [shape: f32[128,256], index: 2, kind: input, shape index: {}]   ;;  %s381_s3 = inlined_call_operand.hbm [shape: f32[8,256], index: 3, kind: output, shape index: {}]  }
   0x1   :  { %9 = vsyncpa [#allocation6], 0  ;;  %s26_s14 = sshll.u32 %s379_s1, 4  ;;  %s27_s14 = int_to_ptr.hbm [resolvable:$true] %s26_s14 }
   0x2   :  { %10 = vsyncpa [#allocation4], 0  ;;  %s338_s15 = smov [#allocation5]   ;;  %s16_s19 = sshll.u32 %s378_s0, 4  ;;  %s17_s19 = int_to_ptr.hbm [resolvable:$true] %s16_s19 }
   0x3   :  { %s28_s16 = sshll.u32 %s338_s15, 4  ;;  %s339_s20 = smov 128   ;;  %s29_s16 = int_to_ptr.vmem [resolvable:$true] %s28_s16 }
   0x4   :  { %s340_s21 = smov 8   ;;  %s341_s22 = smov [#allocation2]  }
   0x5   :  { %34 = dma.hbm_to_vmem [thread:$0]  %s27_s14, 4096, %s29_s16, [#allocation6], %s339_s20, %s339_s20, %s340_s21  }
   0x6   :  { %s18_s23 = sshll.u32 %s341_s22, 4  ;;  %s39_s26 = sshll.u32 %s380_s2, 4  ;;  %s19_s23 = int_to_ptr.vmem [resolvable:$true] %s18_s23  ;;  %s40_s26 = int_to_ptr.hbm [resolvable:$true] %s39_s26 }
   0x7   :  { %21 = dma.hbm_to_vmem [thread:$0]  %s17_s19, 256, %s19_s23, [#allocation3]  }
   0x8   :  { %s342_s1 = smov [#allocation7]   ;;  %s343_s28 = smov 256  }
   0x9   :  { %s41_s27 = sshll.u32 %s342_s1, 4  ;;  %s344_s29 = smov 16   ;;  %s42_s27 = int_to_ptr.vmem [resolvable:$true] %s41_s27 }
   0xa   :  { %47 = dma.hbm_to_vmem [thread:$0]  %s40_s26, 4096, %s42_s27, [#allocation6], %s343_s28, %s343_s28, %s344_s29  }
   0xb   :  { %332 = dma.done.wait [#allocation3], 256  }
   0xc   :  { %333 = vsyncadd [#allocation3], 4294967040 }
   0xd   :  { %334 = dma.done.wait [#allocation6], 8192  }
   0xe   :  { %335 = vsyncadd [#allocation6], 4294959104  ;;  %v77_v0 = vld [vmem:[#allocation5 + $0x78] sm:$0xff]  ;;  %v76_v2 = vld [vmem:[#allocation5 + $0x70] sm:$0xff]  ;;  %s345_s0 = smov [#allocation8]   ;;  %s217_s5 = sshll.u32 %s381_s3, 4  ;;  %s218_s5 = int_to_ptr.hbm [resolvable:$true] %s217_s5 }
   0xf   :  { %v93_v1 = vld [vmem:[#allocation5 + $0xf8] sm:$0xff]  ;;  %94 = vmatpush.msra.mxu0 %v77_v0  ;;  %v92_v3 = vld [vmem:[#allocation5 + $0xf0] sm:$0xff]  ;;  %v75_v4 = vld [vmem:[#allocation5 + $0x68] sm:$0xff]  ;;  %s215_s2 = sshll.u32 %s345_s0, 4  ;;  %s216_s2 = int_to_ptr.vmem [resolvable:$true] %s215_s2 }
  0x10   :  { %114 = vmatpush.msra.mxu1 %v93_v1  ;;  %v91_v5 = vld [vmem:[#allocation5 + $0xe8] sm:$0xff]  ;;  %v74_v6 = vld [vmem:[#allocation5 + $0x60] sm:$0xff]  ;;  %v73_v8 = vld [vmem:[#allocation5 + $0x58] sm:$0xff] }
  0x11   :  { %95 = vmatpush.msra.mxu0 %v76_v2  ;;  %v90_v7 = vld [vmem:[#allocation5 + $0xe0] sm:$0xff]  ;;  %v89_v9 = vld [vmem:[#allocation5 + $0xd8] sm:$0xff]  ;;  %v72_v10 = vld [vmem:[#allocation5 + $0x50] sm:$0xff] }
  0x12   :  { %115 = vmatpush.msra.mxu1 %v92_v3  ;;  %v88_v11 = vld [vmem:[#allocation5 + $0xd0] sm:$0xff]  ;;  %v71_v12 = vld [vmem:[#allocation5 + $0x48] sm:$0xff]  ;;  %v70_v14 = vld [vmem:[#allocation5 + $0x40] sm:$0xff] }
  0x13   :  { %96 = vmatpush.msra.mxu0 %v75_v4  ;;  %v87_v13 = vld [vmem:[#allocation5 + $0xc8] sm:$0xff]  ;;  %v164_v15 = vld [vmem:[#allocation7 + $0xf0] sm:$0xff]  ;;  %v165_v16 = vld [vmem:[#allocation7 + $0xf8] sm:$0xff] }
  0x14   :  { %116 = vmatpush.msra.mxu1 %v91_v5  ;;  %v86_v17 = vld [vmem:[#allocation5 + $0xc0] sm:$0xff]  ;;  %166 = vmatpush.msra.mxu2 %v164_v15  ;;  %v163_v19 = vld [vmem:[#allocation7 + $0xe8] sm:$0xff]  ;;  %v160_v20 = vld [vmem:[#allocation7 + $0xd0] sm:$0xff] }
  0x15   :  { %97 = vmatpush.msra.mxu0 %v74_v6  ;;  %186 = vmatpush.msra.mxu3 %v165_v16  ;;  %v162_v18 = vld [vmem:[#allocation7 + $0xe0] sm:$0xff]  ;;  %v161_v21 = vld [vmem:[#allocation7 + $0xd8] sm:$0xff]  ;;  %v159_v25 = vld [vmem:[#allocation7 + $0xc8] sm:$0xff] }
  0x16   :  { %117 = vmatpush.msra.mxu1 %v90_v7  ;;  %v69_v22 = vld [vmem:[#allocation5 + $0x38] sm:$0xff]  ;;  %167 = vmatpush.msra.mxu2 %v162_v18  ;;  %v158_v24 = vld [vmem:[#allocation7 + $0xc0] sm:$0xff]  ;;  %v68_v26 = vld [vmem:[#allocation5 + $0x30] sm:$0xff] }
  0x17   :  { %98 = vmatpush.msra.mxu0 %v73_v8  ;;  %v85_v23 = vld [vmem:[#allocation5 + $0xb8] sm:$0xff]  ;;  %187 = vmatpush.msra.mxu3 %v163_v19  ;;  %v84_v27 = vld [vmem:[#allocation5 + $0xb0] sm:$0xff]  ;;  %v67_v30 = vld [vmem:[#allocation5 + $0x28] sm:$0xff] }
  0x18   :  { %118 = vmatpush.msra.mxu1 %v89_v9  ;;  %168 = vmatpush.msra.mxu2 %v160_v20  ;;  %v156_v28 = vld [vmem:[#allocation7 + $0xb0] sm:$0xff]  ;;  %v157_v29 = vld [vmem:[#allocation7 + $0xb8] sm:$0xff]  ;;  %v83_v31 = vld [vmem:[#allocation5 + $0xa8] sm:$0xff] }
  0x19   :  { %99 = vmatpush.msra.mxu0 %v72_v10  ;;  %188 = vmatpush.msra.mxu3 %v161_v21  ;;  %v154_v32 = vld [vmem:[#allocation7 + $0xa0] sm:$0xff]  ;;  %v155_v33 = vld [vmem:[#allocation7 + $0xa8] sm:$0xff]  ;;  %v152_v36 = vld [vmem:[#allocation7 + $0x90] sm:$0xff] }
  0x1a   :  { %119 = vmatpush.msra.mxu1 %v88_v11  ;;  %169 = vmatpush.msra.mxu2 %v158_v24  ;;  %v66_v34 = vld [vmem:[#allocation5 + $0x20] sm:$0xff]  ;;  %v153_v37 = vld [vmem:[#allocation7 + $0x98] sm:$0xff]  ;;  %v151_v41 = vld [vmem:[#allocation7 + $0x88] sm:$0xff] }
  0x1b   :  { %100 = vmatpush.msra.mxu0 %v71_v12  ;;  %189 = vmatpush.msra.mxu3 %v159_v25  ;;  %v82_v35 = vld [vmem:[#allocation5 + $0xa0] sm:$0xff]  ;;  %v65_v38 = vld [vmem:[#allocation5 + $0x18] sm:$0xff]  ;;  %v64_v42 = vld [vmem:[#allocation5 + $0x10] sm:$0xff] }
  0x1c   :  { %120 = vmatpush.msra.mxu1 %v87_v13  ;;  %170 = vmatpush.msra.mxu2 %v156_v28  ;;  %v81_v39 = vld [vmem:[#allocation5 + $0x98] sm:$0xff]  ;;  %v150_v40 = vld [vmem:[#allocation7 + $0x80] sm:$0xff]  ;;  %v80_v43 = vld [vmem:[#allocation5 + $0x90] sm:$0xff] }
  0x1d   :  { %101 = vmatpush.msra.mxu0 %v70_v14  ;;  %190 = vmatpush.msra.mxu3 %v157_v29  ;;  %v148_v44 = vld [vmem:[#allocation7 + $0x70] sm:$0xff]  ;;  %v149_v45 = vld [vmem:[#allocation7 + $0x78] sm:$0xff]  ;;  %v63_v46 = vld [vmem:[#allocation5 + $0x8] sm:$0xff] }
  0x1e   :  { %121 = vmatpush.msra.mxu1 %v86_v17  ;;  %171 = vmatpush.msra.mxu2 %v154_v32  ;;  %v79_v47 = vld [vmem:[#allocation5 + $0x88] sm:$0xff]  ;;  %v146_v48 = vld [vmem:[#allocation7 + $0x60] sm:$0xff]  ;;  %v60_v52 = vld [vmem:[#allocation2] sm:$0xff] }
  0x1f   :  { %102 = vmatpush.msra.mxu0 %v69_v22  ;;  %191 = vmatpush.msra.mxu3 %v155_v33  ;;  %v147_v49 = vld [vmem:[#allocation7 + $0x68] sm:$0xff]  ;;  %v62_v50 = vld [vmem:[#allocation5] sm:$0xff]  ;;  %v61_v53 = vld [vmem:[#allocation2 + $0x8] sm:$0xff] }
  0x20   :  { %122 = vmatpush.msra.mxu1 %v85_v23  ;;  %172 = vmatpush.msra.mxu2 %v152_v36  ;;  %v78_v51 = vld [vmem:[#allocation5 + $0x80] sm:$0xff]  ;;  %v144_v54 = vld [vmem:[#allocation7 + $0x50] sm:$0xff]  ;;  %v145_v55 = vld [vmem:[#allocation7 + $0x58] sm:$0xff] }
  0x21   :  { %103 = vmatpush.msra.mxu0 %v68_v26  ;;  %192 = vmatpush.msra.mxu3 %v153_v37  ;;  %v142_v56 = vld [vmem:[#allocation7 + $0x40] sm:$0xff]  ;;  %v143_v57 = vld [vmem:[#allocation7 + $0x48] sm:$0xff]  ;;  %v140_v58 = vld [vmem:[#allocation7 + $0x30] sm:$0xff] }
  0x22   :  { %123 = vmatpush.msra.mxu1 %v84_v27  ;;  %173 = vmatpush.msra.mxu2 %v150_v40  ;;  %v141_v59 = vld [vmem:[#allocation7 + $0x38] sm:$0xff]  ;;  %v138_v60 = vld [vmem:[#allocation7 + $0x20] sm:$0xff]  ;;  %v139_v61 = vld [vmem:[#allocation7 + $0x28] sm:$0xff] }
  0x23   :  { %104 = vmatpush.msra.mxu0 %v67_v30  ;;  %193 = vmatpush.msra.mxu3 %v151_v41  ;;  %v136_v62 = vld [vmem:[#allocation7 + $0x10] sm:$0xff]  ;;  %v137_v63 = vld [vmem:[#allocation7 + $0x18] sm:$0xff]  ;;  %v134_v0 = vld [vmem:[#allocation7] sm:$0xff] }
  0x24   :  { %124 = vmatpush.msra.mxu1 %v83_v31  ;;  %174 = vmatpush.msra.mxu2 %v148_v44  ;;  %v135_v1 = vld [vmem:[#allocation7 + $0x8] sm:$0xff] }
  0x25   :  { %105 = vmatpush.msra.mxu0 %v66_v34  ;;  %194 = vmatpush.msra.mxu3 %v149_v45 }
  0x26   :  { %125 = vmatpush.msra.mxu1 %v82_v35  ;;  %175 = vmatpush.msra.mxu2 %v146_v48 }
  0x27   :  { %106 = vmatpush.msra.mxu0 %v65_v38  ;;  %195 = vmatpush.msra.mxu3 %v147_v49 }
  0x28   :  { %126 = vmatpush.msra.mxu1 %v81_v39  ;;  %176 = vmatpush.msra.mxu2 %v144_v54 }
  0x29   :  { %107 = vmatpush.msra.mxu0 %v64_v42  ;;  %196 = vmatpush.msra.mxu3 %v145_v55 }
  0x2a   :  { %127 = vmatpush.msra.mxu1 %v80_v43  ;;  %177 = vmatpush.msra.mxu2 %v142_v56 }
  0x2b   :  { %108 = vmatpush.msra.mxu0 %v63_v46  ;;  %197 = vmatpush.msra.mxu3 %v143_v57 }
  0x2c   :  { %128 = vmatpush.msra.mxu1 %v79_v47  ;;  %178 = vmatpush.msra.mxu2 %v140_v58 }
  0x2d   :  { %109 = vmatpush.msra.mxu0 %v62_v50  ;;  %198 = vmatpush.msra.mxu3 %v141_v59 }
  0x2e   :  { %129 = vmatpush.msra.mxu1 %v78_v51  ;;  %110 = vmatmul.f32.vlgmr.msra.gmra.mxu0 %v60_v52 }
  0x2f   :  { %130 = vmatmul.f32.vlgmr.msra.gmra.mxu1 %v61_v53  ;;  %179 = vmatpush.msra.mxu2 %v138_v60 }
  0x30   :  { %199 = vmatpush.msra.mxu3 %v139_v61 }
  0x31   :  { %180 = vmatpush.msra.mxu2 %v136_v62 }
  0x32   :  { %200 = vmatpush.msra.mxu3 %v137_v63 }
  0x33   :  { %181 = vmatpush.msra.mxu2 %v134_v0 }
  0x34   :  { %201 = vmatpush.msra.mxu3 %v135_v1 }
  0xab   :  { %v111_v2 = vpop.f32.mrf.mxu0 }
  0xac   :  { %v131_v3 = vpop.f32.mrf.mxu1 }
  0xad   :  { %v132_v4 = vadd.f32 %v131_v3, %v111_v2 }
  0xaf   :  { %182 = vmatmul.f32.vlgmr.msra.gmra.mxu2 %v132_v4  ;;  %202 = vmatmul.f32.vlgmr.msra.gmra.mxu3 %v132_v4 }
 0x132   :  { %v183_v5 = vpop.f32.mrf.mxu2  ;;  %v203_v6 = vpop.f32.mrf.mxu3 }
 0x133   :  { %v206_v7 = vadd.f32 %v183_v5, %v60_v52  ;;  %v207_v8 = vadd.f32 %v203_v6, %v61_v53 }
 0x135   :  { %208 = vst [vmem:[#allocation8] sm:$0xff] %v206_v7 }
 0x136   :  { %209 = vst [vmem:[#allocation8 + $0x8] sm:$0xff] %v207_v8 }
 0x137   :  { %220 = dma.vmem_to_hbm [thread:$0]  %s216_s2, 256, %s218_s5, [#allocation4]  }
 0x138   :  { %336 = dma.done.wait [#allocation4], 256  }
 0x139   :  { %337 = vsyncadd [#allocation4], 4294967040 }
 0x13a   :  { %225 = vsyncpa [#allocation3], 1 }
 0x13b   :  { %226 = vsyncpa [#allocation6], 1 }
 0x13c   :  { %227 = vsyncpa [#allocation4], 1 }

</bundles_post_ra>
